<compile_context>
chip_gen: v5e
topology: v5e:2x2
jax: 0.10.0
libtpu: 0.0.40
codegen_flags: <defaults>
</compile_context>

<pallas_src>
import jax
import jax.numpy as jnp
from jax.experimental import pallas as pl
from jax.experimental.pallas import tpu as pltpu

_LOG2E = 1.4426950408889634


def gaussian_mf_kernel(x_ref, mean_ref, scale2_ref, o_ref):
    # x_ref:      (T, 1)      f32   batch tile on the sublane axis
    # mean_ref:   (1, M)      f32   resident (index_map returns (0, 0) every step)
    # scale2_ref: (1, M)      f32   = -0.5 * log2(e) / sigma**2 (hoisted to wrapper)
    # o_ref:      (T, M)      out dtype (f32 or bf16)
    d = x_ref[...] - mean_ref[...]                       # (T, 1) - (1, M) -> (T, M)
    o_ref[...] = jnp.exp2(scale2_ref[...] * (d * d)).astype(o_ref.dtype)


def _round_up(n, m):
    return ((n + m - 1) // m) * m


def _vmem_budget_bytes():
    """Generation-aware per-call VMEM budget for double-buffered in+out tiles."""
    try:
        cap = pltpu.get_tpu_info().vmem_capacity_bytes   # v5e/v6e: 128 MiB, v7x: 64 MiB
    except Exception:
        cap = 64 * 1024 * 1024                           # conservative fallback (v7x)
    # Leave headroom for the other TensorCore (v7x), resident params, compiler scratch.
    return max(8 * 1024 * 1024, min(cap // 4, 48 * 1024 * 1024))


def _use_core_parallel():
    """True only on v7x-class chips (2 TensorCores per chip)."""
    try:
        kind = jax.devices()[0].device_kind.lower().replace(" ", "")
    except Exception:
        return False
    return ("v7" in kind) or ("tpu7" in kind)


def gaussian_mf(x, mean, sigma, *, out_dtype=jnp.float32):
    """x: (batch,); mean/sigma: (num_mf,) -> (batch, num_mf) Gaussian memberships."""
    batch = x.shape[0]
    num_mf = mean.shape[0]
    out_itemsize = jnp.dtype(out_dtype).itemsize

    x_col = x.reshape(batch, 1).astype(jnp.float32)
    mean_row = mean.reshape(1, num_mf).astype(jnp.float32)
    # Fold the per-element divide and the exp->exp2 conversion into a tiny precompute.
    scale2_row = (-0.5 * _LOG2E / (sigma.astype(jnp.float32) ** 2)).reshape(1, num_mf)

    # ---- tile selection: as large as the VMEM budget allows (double-buffered) ----
    budget = _vmem_budget_bytes()
    lanes = _round_up(num_mf, 128)
    # VMEM bytes per batch row: x column lane-pads to one f32 vreg column (512 B / row)
    # plus the lane-padded output row.
    per_row = 512 + lanes * out_itemsize
    tile_max = max(8, (budget // (2 * per_row)) // 8 * 8)
    if batch <= tile_max:
        tile = batch                       # single block == full dims (always legal)
        grid = (1,)
    else:
        tile = tile_max                    # multiple of 8; last block may be partial
        grid = (pl.cdiv(batch, tile),)

    dim_sem = (pltpu.CORE_PARALLEL,) if (_use_core_parallel() and grid[0] >= 2) \
        else (pltpu.PARALLEL,)

    rows = grid[0] * tile                  # rows actually processed (incl. clipped block)
    cost = pl.CostEstimate(
        flops=3 * rows * num_mf,
        transcendentals=rows * num_mf,
        bytes_accessed=4 * rows + 8 * num_mf + out_itemsize * rows * num_mf,
    )

    out = pl.pallas_call(
        gaussian_mf_kernel,
        out_shape=jax.ShapeDtypeStruct((batch, num_mf), out_dtype),
        grid_spec=pltpu.PrefetchScalarGridSpec(
            num_scalar_prefetch=0,
            grid=grid,
            in_specs=[
                pl.BlockSpec((tile, 1), lambda i: (i, 0)),       # x batch tile
                pl.BlockSpec((1, num_mf), lambda i: (0, 0)),     # mean (resident)
                pl.BlockSpec((1, num_mf), lambda i: (0, 0)),     # scale2 (resident)
            ],
            out_specs=pl.BlockSpec((tile, num_mf), lambda i: (i, 0)),
        ),
        compiler_params=pltpu.CompilerParams(
            dimension_semantics=dim_sem,
            vmem_limit_bytes=int(budget + (2 << 20)),
        ),
        cost_estimate=cost,
    )(x_col, mean_row, scale2_row)

    return out


if __name__ == "__main__":
    # Deterministic parameter init, mirroring the module's __init__:
    #   mean  = linspace(0.2, 0.8, num_mf);  sigma = full((num_mf,), 0.1)
    num_mf = 8
    batch = 64
    mean = jnp.linspace(0.2, 0.8, num_mf, dtype=jnp.float32)
    sigma = jnp.full((num_mf,), 0.1, dtype=jnp.float32)

    # Deterministic example input (crisp ANFIS features in [0, 1]).
    key = jax.random.PRNGKey(0)
    x = jax.random.uniform(key, (batch,), dtype=jnp.float32)

    out = gaussian_mf(x, mean, sigma)
    out = jax.block_until_ready(out)

    # Pure-JAX reference (same math as the PyTorch forward).
    ref = jnp.exp(-0.5 * ((x[:, None] - mean[None, :]) / sigma[None, :]) ** 2)
    assert out.shape == (batch, num_mf)
    assert jnp.allclose(out, ref, atol=1e-5, rtol=1e-5)

    print("KERNEL_OK")
</pallas_src>

<mosaic_0001>
module attributes {stable_mosaic.version = 11 : i64} {
  func.func @gaussian_mf_kernel(%arg0: i32, %arg1: memref<64x1xf32, #tpu.memory_space<vmem>>, %arg2: memref<1x8xf32, #tpu.memory_space<vmem>>, %arg3: memref<1x8xf32, #tpu.memory_space<vmem>>, %arg4: memref<64x8xf32, #tpu.memory_space<vmem>>) attributes {dimension_semantics = [#tpu.dimension_semantics<parallel>], iteration_bounds = array<i64: 1>, scalar_prefetch = 0 : i64, scratch_operands = 0 : i64, tpu.core_type = #tpu.core_type<tc>, window_params = [{transform_indices = @transform_0, window_bounds = array<i64: 64, 1>}, {pipeline_mode = #tpu.pipeline_mode<synchronous>, transform_indices = @transform_1, window_bounds = array<i64: 1, 8>}, {pipeline_mode = #tpu.pipeline_mode<synchronous>, transform_indices = @transform_2, window_bounds = array<i64: 1, 8>}, {transform_indices = @transform_3, window_bounds = array<i64: 64, 8>}]} {
    %c0 = arith.constant 0 : index
    %c0_0 = arith.constant 0 : index
    %0 = vector.load %arg1[%c0, %c0_0] : memref<64x1xf32, #tpu.memory_space<vmem>>, vector<64x1xf32>
    %c0_1 = arith.constant 0 : index
    %c0_2 = arith.constant 0 : index
    %1 = vector.load %arg2[%c0_1, %c0_2] : memref<1x8xf32, #tpu.memory_space<vmem>>, vector<1x8xf32>
    %2 = vector.broadcast %0 : vector<64x1xf32> to vector<64x8xf32>
    %3 = vector.broadcast %1 : vector<1x8xf32> to vector<64x8xf32>
    %4 = arith.subf %2, %3 : vector<64x8xf32>
    %c0_3 = arith.constant 0 : index
    %c0_4 = arith.constant 0 : index
    %5 = vector.load %arg3[%c0_3, %c0_4] : memref<1x8xf32, #tpu.memory_space<vmem>>, vector<1x8xf32>
    %6 = arith.mulf %4, %4 : vector<64x8xf32>
    %7 = vector.broadcast %5 : vector<1x8xf32> to vector<64x8xf32>
    %8 = arith.mulf %7, %6 : vector<64x8xf32>
    %9 = math.exp2 %8 : vector<64x8xf32>
    %c0_5 = arith.constant 0 : index
    %c0_6 = arith.constant 0 : index
    %10 = vector.load %arg4[%c0_5, %c0_6] : memref<64x8xf32, #tpu.memory_space<vmem>>, vector<64x8xf32>
    tpu.vector_store %arg4[%c0_5, %c0_6], %9 {strides = array<i32>} : memref<64x8xf32, #tpu.memory_space<vmem>>, vector<64x8xf32>,
    return
  }
  func.func @transform_0(%arg0: i32) -> (i32, i32) {
    %c0_i32 = arith.constant 0 : i32
    %c0_i32_0 = arith.constant 0 : i32
    return %arg0, %c0_i32 : i32, i32
  }
  func.func @transform_1(%arg0: i32) -> (i32, i32) {
    %c0_i32 = arith.constant 0 : i32
    %c0_i32_0 = arith.constant 0 : i32
    %c0_i32_1 = arith.constant 0 : i32
    return %c0_i32, %c0_i32_0 : i32, i32
  }
  func.func @transform_2(%arg0: i32) -> (i32, i32) {
    %c0_i32 = arith.constant 0 : i32
    %c0_i32_0 = arith.constant 0 : i32
    %c0_i32_1 = arith.constant 0 : i32
    return %c0_i32, %c0_i32_0 : i32, i32
  }
  func.func @transform_3(%arg0: i32) -> (i32, i32) {
    %c0_i32 = arith.constant 0 : i32
    %c0_i32_0 = arith.constant 0 : i32
    return %arg0, %c0_i32 : i32, i32
  }
}

</mosaic_0001>

<bundles_post_ra>
// kernel: tpu_custom_call.1
= control target key start
LH: loop header
LB: loop body
LE: loop exit
PB: predicated region body
PF: predicated region fallthrough
CT: control target
= control target key end

     0   :  { %v137_v0 = vmov 0   ;;  %vm102_vm0 = vcmask 64512   ;;  %s220_s0 = inlined_call_operand.vmem [shape: f32[64,1], index: 0, kind: input, shape index: {}]   ;;  %s221_s1 = inlined_call_operand.vmem [shape: f32[1,8], index: 1, kind: input, shape index: {}]   ;;  %s222_s2 = inlined_call_operand.vmem [shape: f32[1,8], index: 2, kind: input, shape index: {}]   ;;  %s223_s3 = inlined_call_operand.vmem [shape: f32[64,8], index: 3, kind: output, shape index: {}]  }
   0x1   :  { %117 = vset.pattern.permute.xlu1 %v137_v0  ;;  %116 = vset.pattern.permute.xlu0 %v137_v0  ;;  %v16_v1 = vld [vmem:[%s220_s0 + $0x10] sm:$0xff]  ;;  %v14_v2 = vld [vmem:[%s220_s0] sm:$0xff]  ;;  %v17_v4 = vld [vmem:[%s220_s0 + $0x18] sm:$0xff] }
   0x2   :  { %35 = vperm.xlu1 %117, %v16_v1   ;;  %25 = vperm.xlu0 %116, %v14_v2   ;;  %v18_v3 = vld [vmem:[%s220_s0 + $0x20] sm:$0xff]  ;;  %v15_v5 = vld [vmem:[%s220_s0 + $0x8] sm:$0xff]  ;;  %v21_v7 = vld [vmem:[%s220_s0 + $0x38] sm:$0xff] }
   0x3   :  { %118 = vset.pattern.permute.xlu2 %v137_v0  ;;  %v19_v6 = vld [vmem:[%s220_s0 + $0x28] sm:$0xff]  ;;  %v20_v8 = vld [vmem:[%s220_s0 + $0x30] sm:$0xff]  ;;  %v119_v9 = vld [vmem:[%s221_s1] ss:$0 sm:$0xff] }
   0x4   :  { %45 = vperm.xlu2 %118, %v18_v3   ;;  %v120_v12 = vld [vmem:[%s222_s2] ss:$0 sm:$0xff] }
   0xa   :  { %40 = vperm.xlu1 %117, %v17_v4   ;;  %30 = vperm.xlu0 %116, %v15_v5  }
   0xc   :  { %50 = vperm.xlu2 %118, %v19_v6  }
  0x12   :  { %60 = vperm.xlu1 %117, %v21_v7   ;;  %55 = vperm.xlu0 %116, %v20_v8  }
  0x5e   :  { %v46_v10 = vpop.permute.xlu2 %45 }
  0x5f   :  { %v70_v11 = vsub.f32 %v46_v10, %v119_v9 }
  0x61   :  { %v79_v13 = vmul.f32 %v70_v11, %v70_v11 }
  0x63   :  { %v90_v14 = vmul.f32 %v120_v12, %v79_v13 }
  0x65   :  { %121 = vpow2.f32 %v90_v14 }
  0x66   :  { %v51_v15 = vpop.permute.xlu2 %50 }
  0x67   :  { %v71_v16 = vsub.f32 %v51_v15, %v119_v9 }
  0x69   :  { %v80_v17 = vmul.f32 %v71_v16, %v71_v16 }
  0x6b   :  { %v122_v18 = vpop.eup %121  ;;  %v91_v19 = vmul.f32 %v120_v12, %v80_v17 }
  0x6c   :  { %107 = vst.msk [vmem:[%s223_s3 + $0x20] sm:$0xff] %vm102_vm0, %v122_v18 }
  0x6d   :  { %123 = vpow2.f32 %v91_v19 }
  0x73   :  { %v124_v20 = vpop.eup %123 }
  0x74   :  { %v36_v21 = vpop.permute.xlu1 %35  ;;  %v26_v22 = vpop.permute.xlu0 %25  ;;  %108 = vst.msk [vmem:[%s223_s3 + $0x28] sm:$0xff] %vm102_vm0, %v124_v20 }
  0x75   :  { %v68_v23 = vsub.f32 %v36_v21, %v119_v9  ;;  %v66_v24 = vsub.f32 %v26_v22, %v119_v9 }
  0x77   :  { %v77_v25 = vmul.f32 %v68_v23, %v68_v23  ;;  %v75_v26 = vmul.f32 %v66_v24, %v66_v24 }
  0x79   :  { %v88_v27 = vmul.f32 %v120_v12, %v77_v25  ;;  %v86_v28 = vmul.f32 %v120_v12, %v75_v26 }
  0x7b   :  { %125 = vpow2.f32 %v88_v27 }
  0x7c   :  { %127 = vpow2.f32 %v86_v28  ;;  %v41_v29 = vpop.permute.xlu1 %40  ;;  %v31_v30 = vpop.permute.xlu0 %30 }
  0x7d   :  { %v69_v31 = vsub.f32 %v41_v29, %v119_v9  ;;  %v67_v32 = vsub.f32 %v31_v30, %v119_v9 }
  0x7f   :  { %v78_v33 = vmul.f32 %v69_v31, %v69_v31  ;;  %v76_v34 = vmul.f32 %v67_v32, %v67_v32 }
  0x81   :  { %v126_v35 = vpop.eup %125  ;;  %v89_v36 = vmul.f32 %v120_v12, %v78_v33  ;;  %v87_v37 = vmul.f32 %v120_v12, %v76_v34 }
  0x82   :  { %v128_v38 = vpop.eup %127  ;;  %105 = vst.msk [vmem:[%s223_s3 + $0x10] sm:$0xff] %vm102_vm0, %v126_v35 }
  0x83   :  { %103 = vst.msk [vmem:[%s223_s3] sm:$0xff] %vm102_vm0, %v128_v38  ;;  %129 = vpow2.f32 %v89_v36 }
  0x84   :  { %131 = vpow2.f32 %v87_v37  ;;  %v61_v39 = vpop.permute.xlu1 %60  ;;  %v56_v40 = vpop.permute.xlu0 %55 }
  0x85   :  { %v73_v41 = vsub.f32 %v61_v39, %v119_v9  ;;  %v72_v42 = vsub.f32 %v56_v40, %v119_v9 }
  0x87   :  { %v82_v43 = vmul.f32 %v73_v41, %v73_v41  ;;  %v81_v44 = vmul.f32 %v72_v42, %v72_v42 }
  0x89   :  { %v130_v45 = vpop.eup %129  ;;  %v93_v46 = vmul.f32 %v120_v12, %v82_v43  ;;  %v92_v47 = vmul.f32 %v120_v12, %v81_v44 }
  0x8a   :  { %v132_v48 = vpop.eup %131  ;;  %106 = vst.msk [vmem:[%s223_s3 + $0x18] sm:$0xff] %vm102_vm0, %v130_v45 }
  0x8b   :  { %104 = vst.msk [vmem:[%s223_s3 + $0x8] sm:$0xff] %vm102_vm0, %v132_v48  ;;  %133 = vpow2.f32 %v93_v46 }
  0x8c   :  { %135 = vpow2.f32 %v92_v47 }
  0x91   :  { %v134_v49 = vpop.eup %133 }
  0x92   :  { %v136_v50 = vpop.eup %135  ;;  %110 = vst.msk [vmem:[%s223_s3 + $0x38] sm:$0xff] %vm102_vm0, %v134_v49 }
  0x93   :  { %109 = vst.msk [vmem:[%s223_s3 + $0x30] sm:$0xff] %vm102_vm0, %v136_v50 }

</bundles_post_ra>
